<compile_context>
chip_gen: v5e
topology: v5e:2x2
jax: 0.10.0
libtpu: 0.0.40
codegen_flags: <defaults>
</compile_context>

<pallas_src>
import functools

import jax
import jax.numpy as jnp
from jax.experimental import pallas as pl
from jax.experimental.pallas import tpu as pltpu


def _center_loss_kernel(feat_ref, labels_ref, cent_ref, out_ref, acc_ref,
                        *, batch, tile_b, num_classes, inv_total):
    # feat_ref:   VMEM (TB, D)       features tile for this grid step
    # labels_ref: VMEM (TB, 1) i32   labels tile
    # cent_ref:   VMEM (C, D)        whole centers table (resident, constant block)
    # out_ref:    SMEM (1, 1) f32    scalar loss, written at the last step only
    # acc_ref:    VMEM (TB, D) f32   elementwise running sum of diff^2
    step = pl.program_id(0)

    @pl.when(step == 0)
    def _init():
        acc_ref[...] = jnp.zeros_like(acc_ref)

    feats = feat_ref[...].astype(jnp.float32)                      # (TB, D)
    labels = labels_ref[...]                                       # (TB, 1) int32

    # Gather centers[labels] via a one-hot matmul on the otherwise-idle MXU.
    class_iota = jax.lax.broadcasted_iota(jnp.int32, (tile_b, num_classes), 1)
    one_hot = (labels == class_iota).astype(jnp.float32)           # (TB, C)
    cent_batch = jnp.dot(one_hot, cent_ref[...].astype(jnp.float32),
                         preferred_element_type=jnp.float32)       # (TB, D)

    # Mask rows beyond the true batch (batch was padded to a multiple of TB).
    row = step * tile_b + jax.lax.broadcasted_iota(jnp.int32, (tile_b, 1), 0)
    diff = jnp.where(row < batch, feats - cent_batch, 0.0)

    # Elementwise accumulate on the VPU; reduce + scale once at the very end.
    acc_ref[...] += diff * diff

    @pl.when(step == pl.num_programs(0) - 1)
    def _final():
        out_ref[0, 0] = jnp.sum(acc_ref[...]) * inv_total


def center_loss(features, labels, centers, *, max_tile_b=1024):
    """features: [B, D] float, labels: [B] int, centers: [C, D] float -> scalar f32."""
    B, D = features.shape
    C, Dc = centers.shape
    assert D == Dc

    # torch.index_select raises on out-of-range labels; we clamp instead
    # (documented semantic deviation -- a Pallas kernel cannot raise).
    labels_i32 = jnp.clip(labels.astype(jnp.int32), 0, C - 1).reshape(B, 1)

    def round_up(x, m):
        return ((x + m - 1) // m) * m

    # Batch tile: whole (padded) batch in one step when small, else large tiles.
    tile_b = min(round_up(B, 8), max_tile_b)
    b_pad = round_up(B, tile_b)
    num_tiles = b_pad // tile_b

    if b_pad != B:
        features = jnp.pad(features, ((0, b_pad - B), (0, 0)))
        labels_i32 = jnp.pad(labels_i32, ((0, b_pad - B), (0, 0)))

    kernel = functools.partial(
        _center_loss_kernel,
        batch=B, tile_b=tile_b, num_classes=C,
        inv_total=float(1.0 / (B * D)),
    )

    # VMEM budget: features (double-buffered) + labels + resident centers + acc.
    # TODO(synk): when C*D*4 exceeds the per-generation VMEM budget (v7x: 64 MiB),
    # switch to a manual double-buffered row-gather (centers in pl.ANY, per-tile
    # batched DMAs driven by SMEM labels) instead of keeping the table resident.
    feat_bytes = features.dtype.itemsize
    cent_bytes = centers.dtype.itemsize
    vmem_needed = (2 * tile_b * D * feat_bytes      # features, double-buffered
                   + 2 * tile_b * 4                 # labels, double-buffered
                   + 2 * C * D * cent_bytes         # centers table
                   + tile_b * D * 4)                # f32 accumulator scratch
    vmem_limit = int(min(max(2 * vmem_needed, 4 * 1024 * 1024), 48 * 1024 * 1024))

    grid_spec = pltpu.PrefetchScalarGridSpec(
        num_scalar_prefetch=0,
        grid=(num_tiles,),
        in_specs=[
            pl.BlockSpec((tile_b, D), lambda i: (i, 0)),   # features tile
            pl.BlockSpec((tile_b, 1), lambda i: (i, 0)),   # labels tile
            pl.BlockSpec((C, D), lambda i: (0, 0)),        # centers, VMEM-resident
        ],
        out_specs=pl.BlockSpec(memory_space=pltpu.MemorySpace.SMEM),
        scratch_shapes=[pltpu.VMEM((tile_b, D), jnp.float32)],
    )

    out = pl.pallas_call(
        kernel,
        out_shape=jax.ShapeDtypeStruct((1, 1), jnp.float32),
        grid_spec=grid_spec,
        compiler_params=pltpu.CompilerParams(
            # Batch axis accumulates into shared scratch -> "arbitrary".
            # TODO(synk): on v7x, split the reduction across the 2 TensorCores
            # (leading size-2 "parallel" axis with per-core partial sums).
            dimension_semantics=("arbitrary",),
            vmem_limit_bytes=vmem_limit,
        ),
    )(features, labels_i32, centers)
    return out[0, 0]


if __name__ == "__main__":
    num_classes = 10
    feat_dim = 32
    batch = 8

    key = jax.random.PRNGKey(0)
    k_feat, k_lab, k_cent = jax.random.split(key, 3)

    # Deterministic "parameter" init, mirroring nn.Parameter(torch.randn(C, D)).
    centers = jax.random.normal(k_cent, (num_classes, feat_dim), dtype=jnp.float32)

    features = jax.random.normal(k_feat, (batch, feat_dim), dtype=jnp.float32)
    labels = jax.random.randint(k_lab, (batch,), 0, num_classes, dtype=jnp.int32)

    loss = center_loss(features, labels, centers)
    loss = jax.block_until_ready(loss)

    # Pure-JAX reference check (same semantics as the PyTorch module).
    ref = jnp.mean((features - centers[labels]) ** 2)
    assert jnp.allclose(loss, ref, rtol=1e-5, atol=1e-5), (loss, ref)

    print("KERNEL_OK")
</pallas_src>

<mosaic_0001>
module attributes {stable_mosaic.version = 11 : i64} {
  func.func @_center_loss_kernel(%arg0: i32, %arg1: memref<8x32xf32, #tpu.memory_space<vmem>>, %arg2: memref<8x1xi32, #tpu.memory_space<vmem>>, %arg3: memref<10x32xf32, #tpu.memory_space<vmem>>, %arg4: memref<1x1xf32, #tpu.memory_space<smem>>, %arg5: memref<8x32xf32, #tpu.memory_space<vmem>>) attributes {dimension_semantics = [#tpu.dimension_semantics<arbitrary>], iteration_bounds = array<i64: 1>, scalar_prefetch = 0 : i64, scratch_operands = 1 : i64, tpu.core_type = #tpu.core_type<tc>, window_params = [{transform_indices = @transform_0, window_bounds = array<i64: 8, 32>}, {transform_indices = @transform_1, window_bounds = array<i64: 8, 1>}, {pipeline_mode = #tpu.pipeline_mode<synchronous>, transform_indices = @transform_2, window_bounds = array<i64: 10, 32>}, {transform_indices = @transform_3, window_bounds = array<i64: 1, 1>}]} {
    %c0_i32 = arith.constant 0 : i32
    %0 = arith.cmpi eq, %arg0, %c0_i32 : i32
    %1 = arith.extui %0 : i1 to i32
    %c0_i32_0 = arith.constant 0 : i32
    %2 = arith.cmpi ne, %1, %c0_i32_0 : i32
    scf.if %2 {
      %cst_14 = arith.constant 0.000000e+00 : f32
      %30 = vector.broadcast %cst_14 : f32 to vector<8x32xf32>
      %c0_15 = arith.constant 0 : index
      %c0_16 = arith.constant 0 : index
      %31 = vector.load %arg5[%c0_15, %c0_16] : memref<8x32xf32, #tpu.memory_space<vmem>>, vector<8x32xf32>
      tpu.vector_store %arg5[%c0_15, %c0_16], %30 {strides = array<i32>} : memref<8x32xf32, #tpu.memory_space<vmem>>, vector<8x32xf32>,
    } else {
    }
    %c0 = arith.constant 0 : index
    %c0_1 = arith.constant 0 : index
    %3 = vector.load %arg1[%c0, %c0_1] : memref<8x32xf32, #tpu.memory_space<vmem>>, vector<8x32xf32>
    %c0_2 = arith.constant 0 : index
    %c0_3 = arith.constant 0 : index
    %4 = vector.load %arg2[%c0_2, %c0_3] : memref<8x1xi32, #tpu.memory_space<vmem>>, vector<8x1xi32>
    %5 = tpu.iota {dimensions = array<i32: 1>} : vector<8x10xi32>
    %6 = vector.broadcast %4 : vector<8x1xi32> to vector<8x10xi32>
    %7 = arith.cmpi eq, %6, %5 : vector<8x10xi32>
    %8 = arith.extui %7 : vector<8x10xi1> to vector<8x10xi32>
    %9 = arith.sitofp %8 : vector<8x10xi32> to vector<8x10xf32>
    %c0_4 = arith.constant 0 : index
    %c0_5 = arith.constant 0 : index
    %10 = vector.load %arg3[%c0_4, %c0_5] : memref<10x32xf32, #tpu.memory_space<vmem>>, vector<10x32xf32>
    %cst = arith.constant dense<0.000000e+00> : vector<8x32xf32>
    %11 = tpu.matmul %9, %10, %cst {dimension_numbers = #tpu.dot_dimension_numbers<[1], [0], [0], [1], [0, 0, 1, 1], [], []>} : vector<8x10xf32>, vector<10x32xf32>, vector<8x32xf32> -> vector<8x32xf32>
    %c8_i32 = arith.constant 8 : i32
    %12 = arith.muli %arg0, %c8_i32 : i32
    %13 = tpu.iota {dimensions = array<i32: 0>} : vector<8x1xi32>
    %14 = vector.broadcast %12 : i32 to vector<8x1xi32>
    %15 = arith.addi %14, %13 : vector<8x1xi32>
    %c8_i32_6 = arith.constant 8 : i32
    %16 = vector.broadcast %c8_i32_6 : i32 to vector<8x1xi32>
    %17 = arith.cmpi slt, %15, %16 : vector<8x1xi32>
    %18 = arith.subf %3, %11 : vector<8x32xf32>
    %cst_7 = arith.constant 0.000000e+00 : f32
    %19 = vector.shape_cast %17 : vector<8x1xi1> to vector<8x1xi1>
    %20 = vector.broadcast %19 : vector<8x1xi1> to vector<8x32xi1>
    %21 = vector.broadcast %cst_7 : f32 to vector<8x32xf32>
    %22 = arith.select %20, %18, %21 : vector<8x32xi1>, vector<8x32xf32>
    %c0_8 = arith.constant 0 : index
    %c0_9 = arith.constant 0 : index
    %23 = vector.load %arg5[%c0_8, %c0_9] : memref<8x32xf32, #tpu.memory_space<vmem>>, vector<8x32xf32>
    %24 = arith.mulf %22, %22 : vector<8x32xf32>
    %25 = arith.addf %23, %24 : vector<8x32xf32>
    %c0_10 = arith.constant 0 : index
    %c0_11 = arith.constant 0 : index
    %26 = vector.load %arg5[%c0_10, %c0_11] : memref<8x32xf32, #tpu.memory_space<vmem>>, vector<8x32xf32>
    tpu.vector_store %arg5[%c0_10, %c0_11], %25 {strides = array<i32>} : memref<8x32xf32, #tpu.memory_space<vmem>>, vector<8x32xf32>,
    %c0_i32_12 = arith.constant 0 : i32
    %27 = arith.cmpi eq, %arg0, %c0_i32_12 : i32
    %28 = arith.extui %27 : i1 to i32
    %c0_i32_13 = arith.constant 0 : i32
    %29 = arith.cmpi ne, %28, %c0_i32_13 : i32
    scf.if %29 {
      %c0_14 = arith.constant 0 : index
      %c0_15 = arith.constant 0 : index
      %30 = vector.load %arg5[%c0_14, %c0_15] : memref<8x32xf32, #tpu.memory_space<vmem>>, vector<8x32xf32>
      %31 = vector.shape_cast %30 : vector<8x32xf32> to vector<1x8x32xf32>
      %cst_16 = arith.constant dense<0.000000e+00> : vector<1xf32>
      %32 = vector.multi_reduction <add>, %31, %cst_16 [1, 2] : vector<1x8x32xf32> to vector<1xf32>
      %33 = vector.shape_cast %32 : vector<1xf32> to vector<1x1x1xf32>
      %34 = vector.extract %33[0, 0, 0] : f32 from vector<1x1x1xf32>
      %cst_17 = arith.constant 3.906250e-03 : f32
      %35 = arith.mulf %34, %cst_17 : f32
      %c0_18 = arith.constant 0 : index
      %c0_19 = arith.constant 0 : index
      %36 = memref.load %arg4[%c0_18, %c0_19] : memref<1x1xf32, #tpu.memory_space<smem>>
      memref.store %35, %arg4[%c0_18, %c0_19] : memref<1x1xf32, #tpu.memory_space<smem>>
    } else {
    }
    return
  }
  func.func @transform_0(%arg0: i32) -> (i32, i32) {
    %c0_i32 = arith.constant 0 : i32
    %c0_i32_0 = arith.constant 0 : i32
    return %arg0, %c0_i32 : i32, i32
  }
  func.func @transform_1(%arg0: i32) -> (i32, i32) {
    %c0_i32 = arith.constant 0 : i32
    %c0_i32_0 = arith.constant 0 : i32
    return %arg0, %c0_i32 : i32, i32
  }
  func.func @transform_2(%arg0: i32) -> (i32, i32) {
    %c0_i32 = arith.constant 0 : i32
    %c0_i32_0 = arith.constant 0 : i32
    %c0_i32_1 = arith.constant 0 : i32
    return %c0_i32, %c0_i32_0 : i32, i32
  }
  func.func @transform_3(%arg0: i32) -> (i32, i32) {
    %c0_i32 = arith.constant 0 : i32
    %c0_i32_0 = arith.constant 0 : i32
    %c0_i32_1 = arith.constant 0 : i32
    return %c0_i32, %c0_i32_0 : i32, i32
  }
}

</mosaic_0001>

<bundles_post_ra>
// kernel: tpu_custom_call.1
= control target key start
LH: loop header
LB: loop body
LE: loop exit
PB: predicated region body
PF: predicated region fallthrough
CT: control target
= control target key end

     0   :  { %8 = vsyncpa [#allocation4], 0  ;;  %s215_s0 = inlined_call_operand.vmem [shape: f32[8,32], index: 0, kind: input, shape index: {}]   ;;  %s216_s1 = inlined_call_operand.vmem [shape: s32[8,1], index: 1, kind: input, shape index: {}]   ;;  %s217_s2 = inlined_call_operand.hbm [shape: f32[10,32], index: 2, kind: input, shape index: {}]   ;;  %s218_s3 = inlined_call_operand.hbm [shape: f32[1,1], index: 3, kind: output, shape index: {}]  }
   0x1   :  { %9 = vsyncpa [#allocation5], 0  ;;  %s18_s14 = sshll.u32 %s217_s2, 4  ;;  %s177_s15 = smov [#allocation3]   ;;  %s19_s14 = int_to_ptr.hbm [resolvable:$true] %s18_s14 }
   0x2   :  { %s20_s16 = sshll.u32 %s177_s15, 4  ;;  %s178_s17 = smov 128   ;;  %s21_s16 = int_to_ptr.vmem [resolvable:$true] %s20_s16 }
   0x3   :  { %s179_s18 = smov 8  }
   0x4   :  { %26 = dma.hbm_to_vmem [thread:$0]  %s19_s14, 256, %s21_s16, [#allocation4], %s178_s17, %s178_s17, %s179_s18  }
   0x5   :  { %173 = dma.done.wait [#allocation4], 256  }
   0x6   :  { %174 = vsyncadd [#allocation4], 4294967040  ;;  %v180_v0 = vmov 0   ;;  %vm53_vm0 = vcmask 1041408   ;;  %v38_v1 = vld [vmem:[%s216_s1] sm:$0xff]  ;;  %v47_v3 = vld [vmem:[#allocation3] sm:$0xff]  ;;  %v39_v4 = vlaneseq }
   0x7   :  { %136 = vset.pattern.permute.xlu0 %v180_v0  ;;  %v48_v2 = vld [vmem:[#allocation3 + $0x8] sm:$0x3]  ;;  %vm49_vm1 = vcmask 80896   ;;  %v181_v7 = vmov 0.0   ;;  %vm35_vm3 = vcmask 261120   ;;  %v37_v9 = vld [vmem:[%s215_s0] sm:$0xff] }
   0x8   :  { %42 = vperm.xlu0 %136, %v38_v1   ;;  %126 = vmatpush.msk.msra.mxu0 %vm53_vm0, %v48_v2  ;;  %v40_v5 = vand.u32 127, %v39_v4  ;;  %36 = vst.msk [vmem:[#allocation2] sm:$0xff] %vm35_vm3, %v181_v7  ;;  %s114_s0 = sshll.u32 %s218_s3, 4  ;;  %s182_s25 = smov [#allocation6]   ;;  %s115_s0 = int_to_ptr.hbm [resolvable:$true] %s114_s0 }
   0xa   :  { %72 = vmatpush.msra.mxu0 %v47_v3 }
   0xf   :  { %v87_v12 = vld [vmem:[#allocation2] sm:$0xff] }
  0x7a   :  { %v43_v6 = vpop.permute.xlu0 %42 }
  0x7b   :  { %vm44_vm2 = vcmp.eq.s32.totalorder %v43_v6, %v40_v5 }
  0x7c   :  { %v125_v8 = vsel %vm44_vm2, 1.0, %v181_v7 }
  0x7d   :  { %127 = vmatmul.msk.f32.vlgmr.msra.gmra.mxu0 %vm49_vm1, %v125_v8 }
  0xfa   :  { %v74_v10 = vpop.f32.mrf.mxu0 }
  0xfb   :  { %v83_v11 = vsub.f32 %v37_v9, %v74_v10 }
  0xfd   :  { %v88_v13 = vmul.f32 %v83_v11, %v83_v11 }
  0xff   :  { %v89_v14 = vadd.f32 %v88_v13, %v87_v12 }
 0x101   :  { %91 = vst.msk [vmem:[#allocation2] sm:$0xff] %vm35_vm3, %v89_v14 }
 0x108   :  { %v95_v15 = vld [vmem:[#allocation2] sm:$0xff] }
 0x109   :  { %v96_v16 = vsel %vm35_vm3, %v95_v15, 0.0 }
 0x10a   :  { %97 = vadd.xlane.f32.xlu0 %v96_v16 }
 0x17d   :  { %v98_v17 = vpop.xlane.xlu0 %97 }
 0x17e   :  { %v99_v18 = vrot.slane %v98_v17, 4 }
 0x180   :  { %v100_v19 = vadd.f32 %v99_v18, %v98_v17 }
 0x182   :  { %v101_v20 = vrot.slane %v100_v19, 2 }
 0x184   :  { %v102_v21 = vadd.f32 %v101_v20, %v100_v19 }
 0x186   :  { %v103_v22 = vrot.slane %v102_v21, 1 }
 0x188   :  { %v104_v23 = vadd.f32 %v103_v22, %v102_v21 }
 0x18a   :  { %128 = vpush %v104_v23 }
 0x1bb   :  { %s129_s23 = spop %128 }
 0x1bc   :  { %s106_s24 = smul.f32 0.00390625, %s129_s23 }
 0x1be   :  { %108 = sst [smem:[#allocation6]] %s106_s24 }
 0x1bf   :  { %117 = dma.smem_to_hbm %s182_s25, 16, %s115_s0, [#allocation5]  }
 0x1c0   :  { %175 = dma.done.wait [#allocation5], 16  }
 0x1c1   :  { %176 = vsyncadd [#allocation5], 4294967280 }
 0x1c2   :  { %122 = sfence }
 0x1c3   :  { %123 = vsyncpa [#allocation4], 1 }
 0x1c4   :  { %124 = vsyncpa [#allocation5], 1 }

</bundles_post_ra>
